<compile_context>
chip_gen: v7x
topology: tpu7x:2x2x1
jax: 0.10.0
libtpu: 0.0.40
codegen_flags: <defaults>
</compile_context>

<pallas_src>
import jax
import jax.numpy as jnp
from jax.experimental import pallas as pl
from jax.experimental.pallas import tpu as pltpu


def _round_up(x: int, m: int) -> int:
    return ((x + m - 1) // m) * m


def _cf_kernel(ue_ref, ie_ref, wb_ref, o_ref):
    # ue_ref, ie_ref: (E, Bt) VMEM tiles — batch on the 128-lane axis.
    # wb_ref:         (2,) f32 SMEM -> [weight, bias] of the 1x1 Linear.
    # o_ref:          (1, Bt) f32 VMEM — lane-dense output row.
    ue = ue_ref[...].astype(jnp.float32)
    ie = ie_ref[...].astype(jnp.float32)
    # Per-column dot product: VPU multiply + sublane reduce -> (1, Bt).
    rating = jnp.sum(ue * ie, axis=0, keepdims=True)
    w = wb_ref[0]                     # scalar reads from SMEM
    b = wb_ref[1]
    rating = rating * w + b           # nn.Linear(1, 1)
    o_ref[...] = jax.nn.sigmoid(rating)


def _choose_block_b(E: int, elem_bytes: int = 4) -> int:
    # Keep 2 inputs x 2 pipeline buffers x (E * Bt * elem_bytes) under ~24 MiB
    # so the default scoped-VMEM limit is respected on v5e/v6e/v7x alike.
    budget = 24 << 20
    bt = budget // (2 * 2 * E * elem_bytes)
    bt = max(128, (bt // 128) * 128)
    return min(bt, 1024)


def simple_cf_forward(u, i, user_table, item_table, lin_w, lin_b, *, block_b=None):
    """Pallas implementation of SimpleCF.forward.

    u, i: int32 index vectors of shape (B,)
    user_table: (n_users, E), item_table: (n_items, E)  (f32 or bf16)
    lin_w, lin_b: scalars of the 1->1 Linear layer
    returns: (B, 1, 1) f32, matching the torch output shape.
    """
    # Embedding lookup (glue; data-dependent gather stays in XLA — see TODO).
    ue = jnp.take(user_table, u, axis=0)   # (B, E)
    ie = jnp.take(item_table, i, axis=0)   # (B, E)
    B, E = ue.shape

    # Lane-dense layout: batch on the lane (last) axis, embedding on sublanes.
    ue_t = ue.T                            # (E, B)
    ie_t = ie.T

    if block_b is None:
        block_b = min(_choose_block_b(E, ue_t.dtype.itemsize),
                      _round_up(B, 128))
    b_pad = _round_up(B, block_b)
    if b_pad != B:
        pad = b_pad - B
        ue_t = jnp.pad(ue_t, ((0, 0), (0, pad)))
        ie_t = jnp.pad(ie_t, ((0, 0), (0, pad)))

    wb = jnp.stack([jnp.asarray(lin_w), jnp.asarray(lin_b)]).astype(jnp.float32)

    num_tiles = b_pad // block_b

    out = pl.pallas_call(
        _cf_kernel,
        out_shape=jax.ShapeDtypeStruct((1, b_pad), jnp.float32),
        grid=(num_tiles,),
        in_specs=[
            pl.BlockSpec((E, block_b), lambda b: (0, b)),
            pl.BlockSpec((E, block_b), lambda b: (0, b)),
            pl.BlockSpec(memory_space=pltpu.MemorySpace.SMEM),
        ],
        out_specs=pl.BlockSpec((1, block_b), lambda b: (0, b)),
        compiler_params=pltpu.CompilerParams(
            dimension_semantics=("parallel",)),
    )(ue_t, ie_t, wb)

    return out[0, :B].reshape(B, 1, 1)


def reference_forward(u, i, user_table, item_table, lin_w, lin_b):
    ue = jnp.take(user_table, u, axis=0)[:, None, :]         # (B, 1, E)
    ie = jnp.take(item_table, i, axis=0)[:, None, :]         # (B, 1, E)
    rating = jnp.matmul(ue, jnp.swapaxes(ie, 1, 2))           # (B, 1, 1)
    rating = rating * lin_w + lin_b
    return jax.nn.sigmoid(rating)


if __name__ == "__main__":
    key = jax.random.PRNGKey(0)
    k_u, k_i, k_w, k_b, k_ui, k_ii = jax.random.split(key, 6)

    n_users, n_items, embedding_length = 10, 12, 16
    batch = 8

    # Deterministic parameter init (normal_ for embeddings, uniform for the
    # 1x1 Linear), matching the torch module's defaults in spirit.
    user_table = jax.random.normal(k_u, (n_users, embedding_length), jnp.float32)
    item_table = jax.random.normal(k_i, (n_items, embedding_length), jnp.float32)
    lin_w = jax.random.uniform(k_w, (), jnp.float32, -1.0, 1.0)
    lin_b = jax.random.uniform(k_b, (), jnp.float32, -1.0, 1.0)

    u_idx = jax.random.randint(k_ui, (batch,), 0, n_users, jnp.int32)
    i_idx = jax.random.randint(k_ii, (batch,), 0, n_items, jnp.int32)

    out = simple_cf_forward(u_idx, i_idx, user_table, item_table, lin_w, lin_b)
    out = jax.block_until_ready(out)

    ref = reference_forward(u_idx, i_idx, user_table, item_table, lin_w, lin_b)
    assert out.shape == (batch, 1, 1), out.shape
    assert jnp.allclose(out, ref, atol=1e-5, rtol=1e-5), (out, ref)

    print("KERNEL_OK")
</pallas_src>

<mosaic_0001>
module attributes {stable_mosaic.version = 11 : i64} {
  func.func @_cf_kernel(%arg0: i32, %arg1: memref<16x128xf32, #tpu.memory_space<vmem>>, %arg2: memref<16x128xf32, #tpu.memory_space<vmem>>, %arg3: memref<2xf32, #tpu.memory_space<smem>>, %arg4: memref<1x128xf32, #tpu.memory_space<vmem>>) attributes {dimension_semantics = [#tpu.dimension_semantics<parallel>], iteration_bounds = array<i64: 1>, scalar_prefetch = 0 : i64, scratch_operands = 0 : i64, tpu.core_type = #tpu.core_type<tc>, window_params = [{transform_indices = @transform_0, window_bounds = array<i64: 16, 128>}, {transform_indices = @transform_1, window_bounds = array<i64: 16, 128>}, {transform_indices = @transform_2, window_bounds = array<i64: 2>}, {transform_indices = @transform_3, window_bounds = array<i64: 1, 128>}]} {
    %c0 = arith.constant 0 : index
    %c0_0 = arith.constant 0 : index
    %0 = vector.load %arg1[%c0, %c0_0] : memref<16x128xf32, #tpu.memory_space<vmem>>, vector<16x128xf32>
    %c0_1 = arith.constant 0 : index
    %c0_2 = arith.constant 0 : index
    %1 = vector.load %arg2[%c0_1, %c0_2] : memref<16x128xf32, #tpu.memory_space<vmem>>, vector<16x128xf32>
    %2 = arith.mulf %0, %1 : vector<16x128xf32>
    %cst = arith.constant dense<0.000000e+00> : vector<128xf32>
    %3 = vector.multi_reduction <add>, %2, %cst [0] : vector<16x128xf32> to vector<128xf32>
    %4 = vector.shape_cast %3 : vector<128xf32> to vector<1x128xf32>
    %c0_3 = arith.constant 0 : index
    %5 = memref.load %arg3[%c0_3] : memref<2xf32, #tpu.memory_space<smem>>
    %c1 = arith.constant 1 : index
    %6 = memref.load %arg3[%c1] : memref<2xf32, #tpu.memory_space<smem>>
    %7 = vector.broadcast %5 : f32 to vector<1x128xf32>
    %8 = arith.mulf %4, %7 : vector<1x128xf32>
    %9 = vector.broadcast %6 : f32 to vector<1x128xf32>
    %10 = arith.addf %8, %9 : vector<1x128xf32>
    %11 = arith.negf %10 : vector<1x128xf32>
    %12 = math.exp %11 : vector<1x128xf32>
    %cst_4 = arith.constant 1.000000e+00 : f32
    %13 = vector.broadcast %cst_4 : f32 to vector<1x128xf32>
    %14 = arith.addf %13, %12 : vector<1x128xf32>
    %15 = arith.divf %13, %14 : vector<1x128xf32>
    %c0_5 = arith.constant 0 : index
    %c0_6 = arith.constant 0 : index
    %16 = vector.load %arg4[%c0_5, %c0_6] : memref<1x128xf32, #tpu.memory_space<vmem>>, vector<1x128xf32>
    tpu.vector_store %arg4[%c0_5, %c0_6], %15 {strides = array<i32>} : memref<1x128xf32, #tpu.memory_space<vmem>>, vector<1x128xf32>,
    return
  }
  func.func @transform_0(%arg0: i32) -> (i32, i32) {
    %c0_i32 = arith.constant 0 : i32
    %c0_i32_0 = arith.constant 0 : i32
    return %c0_i32, %arg0 : i32, i32
  }
  func.func @transform_1(%arg0: i32) -> (i32, i32) {
    %c0_i32 = arith.constant 0 : i32
    %c0_i32_0 = arith.constant 0 : i32
    return %c0_i32, %arg0 : i32, i32
  }
  func.func @transform_2(%arg0: i32) -> i32 {
    %c0_i32 = arith.constant 0 : i32
    %c0_i32_0 = arith.constant 0 : i32
    return %c0_i32 : i32
  }
  func.func @transform_3(%arg0: i32) -> (i32, i32) {
    %c0_i32 = arith.constant 0 : i32
    %c0_i32_0 = arith.constant 0 : i32
    return %c0_i32, %arg0 : i32, i32
  }
}

</mosaic_0001>

<bundles_post_ra>
// kernel: tpu_custom_call.1
= control target key start
LH: loop header
LB: loop body
LE: loop exit
PB: predicated region body
PF: predicated region fallthrough
CT: control target
= control target key end

     0   :  { %8 = vsyncpa [#allocation3], 0  ;;  %s262_s0 = inlined_call_operand.hbm [shape: f32[16,128], index: 0, kind: input, shape index: {}]   ;;  %s263_s1 = inlined_call_operand.hbm [shape: f32[16,128], index: 1, kind: input, shape index: {}]   ;;  %s264_s2 = inlined_call_operand.vmem [shape: f32[2], index: 2, kind: input, shape index: {}]   ;;  %s265_s3 = inlined_call_operand.hbm [shape: f32[1,128], index: 3, kind: output, shape index: {}]  }
   0x1   :  { %9 = vsyncpa [#allocation7], 0 }
   0x2   :  { %10 = vsyncpa [#allocation5], 0 }
   0x3   :  { %11 = vsyncpa [#allocation4], 0  ;;  %s197_s12 = smov [#allocation2]   ;;  %s111_s16 = scalar_lea.hbm %s262_s0, 256 }
   0x4   :  { %s17_s13 = sshll.u32 %s197_s12, 4  ;;  %p112_p0 = scmp.ne.s32.totalorder %s262_s0, %s111_s16  ;;  %s18_s13 = int_to_ptr.vmem [resolvable:$true] %s17_s13 }
   0x5   :  { %p115_p1 = scmp.lt.u32.totalorder %s111_s16, %s262_s0 }
   0x7   :  { %p117_p2 = pnand %p115_p1, %p112_p0 }
   0x9   :  { %120 = shalt.err (!%p117_p2)
}
   0xa   :  { %s121_s21 = scalar_lea.vmem %s18_s13, 256  ;;  %p126_p4 = scmp.lt.s32.totalorder %s18_s13, %s18_s13 }
   0xb   :  { %p122_p3 = scmp.ne.s32.totalorder %s18_s13, %s121_s21  ;;  %p127_p5 = scmp.lt.s32.totalorder %s121_s21, %s121_s21 }
   0xd   :  { %p128_p6 = por %p127_p5, %p126_p4 }
   0xf   :  { %p129_p7 = pnand %p128_p6, %p122_p3 }
  0x11   :  { %132 = shalt.err (!%p129_p7)
}
  0x12   :  { %s198_s22 = smov 128   ;;  %s199_s23 = smov 8  }
  0x13   :  { %23 = dma.hbm_to_vmem [thread:$0]  %s262_s0, 256, %s18_s13, [#allocation3], %s198_s22, %s198_s22, %s199_s23  }
  0x14   :  { %s200_s26 = smov [#allocation6]   ;;  %s42_s30 = sshll.u32 %s264_s2, 4  ;;  %s43_s30 = int_to_ptr.vmem [resolvable:$true] %s42_s30 }
  0x15   :  { %s29_s27 = sshll.u32 %s200_s26, 4  ;;  %s133_s6 = scalar_lea.hbm %s263_s1, 256  ;;  %s30_s27 = int_to_ptr.vmem [resolvable:$true] %s29_s27 }
  0x16   :  { %p134_p8 = scmp.ne.s32.totalorder %s263_s1, %s133_s6  ;;  %p137_p9 = scmp.lt.u32.totalorder %s133_s6, %s263_s1 }
  0x18   :  { %p139_p10 = pnand %p137_p9, %p134_p8 }
  0x1a   :  { %142 = shalt.err (!%p139_p10)
}
  0x1b   :  { %s143_s0 = scalar_lea.vmem %s30_s27, 256  ;;  %p148_p12 = scmp.lt.s32.totalorder %s30_s27, %s30_s27 }
  0x1c   :  { %p144_p11 = scmp.ne.s32.totalorder %s30_s27, %s143_s0  ;;  %p149_p13 = scmp.lt.s32.totalorder %s143_s0, %s143_s0 }
  0x1e   :  { %p150_p0 = por %p149_p13, %p148_p12 }
  0x20   :  { %p151_p1 = pnand %p150_p0, %p144_p11 }
  0x22   :  { %154 = shalt.err (!%p151_p1)
}
  0x23   :  { %35 = dma.hbm_to_vmem [thread:$0]  %s263_s1, 256, %s30_s27, [#allocation7], %s198_s22, %s198_s22, %s199_s23  }
  0x24   :  { %s155_s12 = scalar_lea.vmem %s43_s30, 16  ;;  %p160_p3 = scmp.lt.s32.totalorder %s43_s30, %s43_s30 }
  0x25   :  { %p156_p2 = scmp.ne.s32.totalorder %s43_s30, %s155_s12  ;;  %p161_p4 = scmp.lt.s32.totalorder %s155_s12, %s155_s12 }
  0x27   :  { %p162_p5 = por %p161_p4, %p160_p3 }
  0x29   :  { %p163_p6 = pnand %p162_p5, %p156_p2 }
  0x2b   :  { %166 = shalt.err (!%p163_p6)
}
  0x2c   :  { %s201_s13 = smov [#allocation8]  }
  0x2d   :  { %45 = dma.vmem_to_smem %s43_s30, 16, %s201_s13, [#allocation5]  }
  0x2e   :  { %189 = dma.done.wait [#allocation3], 256  }
  0x2f   :  { %190 = vsyncadd [#allocation3], 4294967040 }
  0x30   :  { %191 = dma.done.wait [#allocation7], 256  }
  0x31   :  { %192 = vsyncadd [#allocation7], 4294967040 }
  0x32   :  { %193 = dma.done.wait [#allocation5], 16  }
  0x33   :  { %194 = vsyncadd [#allocation5], 4294967280 }
  0x34   :  { %55 = sfence }
  0x35   :  { %v56_v0 = vld [vmem:[#allocation2] sm:$0xff]  ;;  %v57_v1 = vld [vmem:[#allocation2 + $0x8] sm:$0xff]  ;;  %v58_v2 = vld [vmem:[#allocation6] sm:$0xff]  ;;  %s69_s1 = sld [smem:[#allocation8]]  ;;  %s99_s14 = sld [smem:[#allocation8 + $0x1]] }
  0x36   :  { %v59_v3 = vld [vmem:[#allocation6 + $0x8] sm:$0xff]  ;;  %v60_v4 = vmul.f32 %v58_v2, %v56_v0  ;;  %s202_s15 = smov [#allocation9]  }
  0x37   :  { %v61_v5 = vmul.f32 %v59_v3, %v57_v1  ;;  %s88_s16 = sshll.u32 %s202_s15, 4  ;;  %s89_s16 = int_to_ptr.vmem [resolvable:$true] %s88_s16 }
  0x38   :  { %s167_s17 = scalar_lea.vmem %s89_s16, 16  ;;  %s171_s18 = scalar_lea.vmem %s89_s16, 32 }
  0x39   :  { %v62_v6 = vadd.f32 %v61_v5, %v60_v4  ;;  %p168_p7 = scmp.ne.s32.totalorder %s89_s16, %s167_s17  ;;  %p172_p8 = scmp.lt.s32.totalorder %s89_s16, %s89_s16 }
  0x3a   :  { %p173_p9 = scmp.lt.s32.totalorder %s171_s18, %s167_s17 }
  0x3b   :  { %v63_v7 = vrot.slane %v62_v6, 4  ;;  %v71_v12 = vstv %s69_s1  ;;  %v73_v14 = vstv %s99_s14 }
  0x3c   :  { %p174_p10 = por %p173_p9, %p172_p8 }
  0x3d   :  { %v64_v8 = vadd.f32 %v63_v7, %v62_v6 }
  0x3e   :  { %p175_p11 = pnand %p174_p10, %p168_p7 }
  0x3f   :  { %v65_v9 = vrot.slane %v64_v8, 2 }
  0x41   :  { %v66_v10 = vadd.f32 %v65_v9, %v64_v8 }
  0x43   :  { %v67_v11 = vrot.slane %v66_v10, 1 }
  0x45   :  { %v68_v13 = vadd.f32 %v67_v11, %v66_v10 }
  0x47   :  { %v72_v15 = vmul.f32 %v71_v12, %v68_v13 }
  0x49   :  { %v74_v16 = vadd.f32 %v73_v14, %v72_v15 }
  0x4b   :  { %v100_v17 = vmul.f32 -1.442695, %v74_v16 }
  0x4d   :  { %107 = vpow2.f32 %v100_v17 }
  0x57   :  { %v108_v18 = vpop.eup %107 }
  0x58   :  { %v78_v19 = vadd.f32 1.0, %v108_v18 }
  0x5a   :  { %109 = vrcp.f32 %v78_v19 }
  0x64   :  { %v110_v20 = vpop.eup %109 }
  0x65   :  { %81 = vst [vmem:[#allocation9] sm:$0x1] %v110_v20 }
  0x66   :  { %178 = shalt.err (!%p175_p11)
}
  0x67   :  { %s179_s21 = scalar_lea.hbm %s265_s3, 16 }
  0x68   :  { %p180_p12 = scmp.ne.s32.totalorder %s265_s3, %s179_s21  ;;  %p183_p13 = scmp.lt.u32.totalorder %s179_s21, %s265_s3 }
  0x6a   :  { %p185_p0 = pnand %p183_p13, %p180_p12 }
  0x6c   :  { %188 = shalt.err (!%p185_p0)
}
  0x6d   :  { %91 = dma.vmem_to_hbm [thread:$0]  %s89_s16, 16, %s265_s3, [#allocation4]  }
  0x6e   :  { %195 = dma.done.wait [#allocation4], 16  }
  0x6f   :  { %196 = vsyncadd [#allocation4], 4294967280 }
  0x70   :  { %95 = vsyncpa [#allocation3], 1 }
  0x71   :  { %96 = vsyncpa [#allocation7], 1 }
  0x72   :  { %97 = vsyncpa [#allocation4], 1 }
  0x73   :  { %98 = vsyncpa [#allocation5], 1 }

</bundles_post_ra>
